<compile_context>
chip_gen: v7x
topology: tpu7x:2x2x1
jax: 0.10.0
libtpu: 0.0.40
codegen_flags: <defaults>
</compile_context>

<pallas_src>
import math
import functools
import numpy as np
import jax
import jax.numpy as jnp
from jax.experimental import pallas as pl
from jax.experimental.pallas import tpu as pltpu


def _round_up(a, b):
    return ((a + b - 1) // b) * b


# ----------------------------- Pallas kernel ------------------------------ #

def _gmm_kernel(x_ref, b1_ref, b2_ref, const_ref, logw_ref, out_ref, *, k_real):
    x = x_ref[...]                                        # (TN, D) f32
    # quad = sum_d (x - m)^2 * hb
    #      = (x*x) @ hb.T + x @ (-2*m*hb).T + sum(m^2*hb)   [last term in const]
    quad = jnp.dot(x * x, b1_ref[...], preferred_element_type=jnp.float32)
    quad = quad + jnp.dot(x, b2_ref[...], preferred_element_type=jnp.float32)
    ycomp = const_ref[...] - quad                         # (TN, Kpad)
    # logsumexp over real components; padded lanes carry logw = -1e30
    yw = ycomp + logw_ref[...]
    m = jnp.max(yw, axis=-1, keepdims=True)
    ylse = m + jnp.log(jnp.sum(jnp.exp(yw - m), axis=-1, keepdims=True))
    # single lane-dense store: lanes [0,K) = ycomp, padded lanes = ylse
    col = jax.lax.broadcasted_iota(jnp.int32, ycomp.shape, 1)
    out_ref[...] = jnp.where(col < k_real, ycomp, ylse)


def gmm_log_density(x, mean, logbeta, weight, *, pi_term, betafactor, tn=512):
    """Returns (ycomp (N,K), ylse (N,)) computed with a Pallas TPU kernel."""
    x = x.astype(jnp.float32)
    N, D = x.shape
    K = mean.shape[0]
    Kpad = _round_up(K + 1, 128)                 # >= 1 spare lane for ylse

    # row tiling: big tiles, pad N up to a tile multiple
    tn = max(8, min(tn, _round_up(N, 8)))
    Npad = _round_up(N, tn)
    if Npad != N:
        x = jnp.pad(x, ((0, Npad - N), (0, 0)))

    # --- hoisted parameter-only precompute (K x D, one-time) ---
    logbeta_f = logbeta.astype(jnp.float32)
    mean_f = mean.astype(jnp.float32)
    halfbeta = 0.5 * jnp.exp(logbeta_f)                           # (K, D)
    b1 = jnp.zeros((D, Kpad), jnp.float32).at[:, :K].set(halfbeta.T)
    b2 = jnp.zeros((D, Kpad), jnp.float32).at[:, :K].set(
        (-2.0 * mean_f * halfbeta).T)
    comp_const = (pi_term + betafactor * jnp.sum(logbeta_f, axis=-1)
                  - jnp.sum(mean_f * mean_f * halfbeta, axis=-1))  # (K,)
    const = jnp.zeros((1, Kpad), jnp.float32).at[0, :K].set(comp_const)
    logw = jnp.full((1, Kpad), -1e30, jnp.float32).at[0, :K].set(
        jax.nn.log_softmax(weight.astype(jnp.float32)))

    kernel = functools.partial(_gmm_kernel, k_real=K)
    out = pl.pallas_call(
        kernel,
        out_shape=jax.ShapeDtypeStruct((Npad, Kpad), jnp.float32),
        grid=(Npad // tn,),
        in_specs=[
            pl.BlockSpec((tn, D), lambda i: (i, 0)),     # x tile
            pl.BlockSpec((D, Kpad), lambda i: (0, 0)),   # halfbeta.T (padded)
            pl.BlockSpec((D, Kpad), lambda i: (0, 0)),   # (-2*mean*halfbeta).T
            pl.BlockSpec((1, Kpad), lambda i: (0, 0)),   # per-component const
            pl.BlockSpec((1, Kpad), lambda i: (0, 0)),   # log_softmax(weight)
        ],
        out_specs=pl.BlockSpec((tn, Kpad), lambda i: (i, 0)),
        compiler_params=pltpu.CompilerParams(dimension_semantics=("parallel",)),
    )(x, b1, b2, const, logw)

    ycomp = out[:N, :K]
    ylse = out[:N, Kpad - 1]
    return ycomp, ylse


# -------------------------- module re-implementation ----------------------- #

class GaussianMixtureSupervisedPallas:
    """Mirror of scDGD GaussianMixtureSupervised (type='diagonal')."""

    def __init__(self, Nclass, dim, Ncpc=1, type='diagonal', alpha=1,
                 mean_init=(1.0, 1.0), sd_init=(1.0, 1.0), key=None):
        assert type == 'diagonal'
        self.dim = dim
        self.Nclass = Nclass
        self.Ncpc = Ncpc
        self.Nmix = Nclass * Ncpc
        self.alpha = alpha
        self.mean_radius = float(mean_init[0])
        self.mean_hardness = float(mean_init[1])
        sd0 = 0.2 * (mean_init[0] / self.Nmix)
        self.sd_init = (sd0, float(sd_init[1]))
        self.betafactor = 0.5                       # 'diagonal'
        self.bdim = dim
        self.pi_term = -0.5 * dim * math.log(2 * math.pi)
        self.dirichlet_constant = (math.lgamma(self.Nmix * alpha)
                                   - self.Nmix * math.lgamma(alpha))
        self.softball_norm = (math.lgamma(1 + dim * 0.5)
                              - dim * (math.log(self.mean_radius)
                                       + 0.5 * math.log(math.pi)))

        # deterministic parameter init (softball-like sample for the means)
        key = jax.random.PRNGKey(0) if key is None else key
        k1, k2 = jax.random.split(key)
        s = jax.random.normal(k1, (self.Nmix, dim), dtype=jnp.float32)
        s = s / jnp.linalg.norm(s, axis=-1, keepdims=True)
        r = self.mean_radius * jax.random.uniform(
            k2, (self.Nmix, 1), dtype=jnp.float32) ** (1.0 / dim)
        self.mean = (s * r).astype(jnp.float32)
        self.logbeta = jnp.full((self.Nmix, self.bdim),
                                -2.0 * math.log(sd0), dtype=jnp.float32)
        self.logbeta_prior_mean = -2.0 * math.log(sd0)
        self.logbeta_prior_sd = self.sd_init[1]
        self.weight = jnp.ones((self.Nmix,), dtype=jnp.float32)

    # --- prior on parameters (parameter-only scalar -> plain JAX glue) ---
    def prior(self):
        p = self.dirichlet_constant
        if self.alpha != 1:
            p = p + (self.alpha - 1.0) * jnp.sum(
                jnp.log(jax.nn.softmax(self.weight, axis=-1)))
        z_norm = jnp.linalg.norm(self.mean, axis=-1)
        mp = self.softball_norm - jnp.log(
            1.0 + jnp.exp(self.mean_hardness * (z_norm / self.mean_radius - 1.0)))
        p = p + jnp.sum(mp)
        sd = self.logbeta_prior_sd
        lp = (-0.5 * ((self.logbeta - self.logbeta_prior_mean) / sd) ** 2
              - math.log(sd) - 0.5 * math.log(2 * math.pi))
        p = p + jnp.sum(lp)
        return p

    def forward(self, x, label=None):
        ycomp, ylse = gmm_log_density(
            x, self.mean, self.logbeta, self.weight,
            pi_term=self.pi_term, betafactor=self.betafactor)
        prior = self.prior()
        if label is None:
            return ylse + prior

        label = np.asarray(label)
        # TODO(synk): reference PyTorch supervised branch only broadcasts for
        # Ncpc == 1 (halfbeta broadcast fails otherwise); only that case is done.
        assert self.Ncpc == 1
        y_sup_mat = ycomp            # (N, Nclass); log_softmax over size-1 cpc = 0
        n = x.shape[0]
        if 999 in label:
            is_unsup = jnp.asarray(label == 999)
            safe_lab = jnp.where(is_unsup, 0, jnp.asarray(label))
            y_sup = jnp.abs(y_sup_mat[jnp.arange(n), safe_lab] * self.Nclass)
            # NOTE: unlabeled rows get the prior added twice — this mirrors the
            # reference PyTorch implementation (super().forward adds it once,
            # then the supervised forward adds it again at the end).
            y_unsup = ylse + prior
            y = jnp.where(is_unsup, y_unsup, y_sup)
        else:
            y = y_sup_mat[jnp.arange(n), jnp.asarray(label)] * self.Nclass
        return y + prior


# ---------------------------- pure-JAX reference --------------------------- #

def forward_ref(model, x, label=None):
    halfbeta = 0.5 * jnp.exp(model.logbeta)
    y = (model.pi_term
         - jnp.sum((x[:, None, :] - model.mean) ** 2 * halfbeta, axis=-1)
         + model.betafactor * jnp.sum(model.logbeta, axis=-1))
    prior = model.prior()
    if label is None:
        yw = y + jax.nn.log_softmax(model.weight)
        return jax.scipy.special.logsumexp(yw, axis=-1) + prior
    label = np.asarray(label)
    n = x.shape[0]
    if 999 in label:
        is_unsup = label == 999
        yw = y + jax.nn.log_softmax(model.weight)
        y_unsup = jax.scipy.special.logsumexp(yw, axis=-1) + prior
        safe = np.where(is_unsup, 0, label)
        y_sup = jnp.abs(y[jnp.arange(n), safe] * model.Nclass)
        out = jnp.where(jnp.asarray(is_unsup), y_unsup, y_sup)
    else:
        out = y[jnp.arange(n), label] * model.Nclass
    return out + prior


# --------------------------------- demo ------------------------------------ #

if __name__ == "__main__":
    N, dim, Nclass, Ncpc = 16, 32, 4, 1
    key = jax.random.PRNGKey(0)
    kx, kp = jax.random.split(key)
    x = jax.random.normal(kx, (N, dim), dtype=jnp.float32)

    model = GaussianMixtureSupervisedPallas(Nclass, dim, Ncpc=Ncpc, key=kp)

    # unsupervised path (label=None)
    y_unsup = model.forward(x)
    # supervised path with a mix of labeled and unlabeled (999) samples
    labels = np.array([0, 1, 2, 3, 999, 999, 1, 0,
                       2, 3, 999, 0, 1, 2, 3, 999], dtype=np.int32)
    y_mixed = model.forward(x, label=labels)

    jax.block_until_ready((y_unsup, y_mixed))

    np.testing.assert_allclose(np.asarray(y_unsup),
                               np.asarray(forward_ref(model, x)),
                               rtol=1e-4, atol=1e-4)
    np.testing.assert_allclose(np.asarray(y_mixed),
                               np.asarray(forward_ref(model, x, labels)),
                               rtol=1e-4, atol=1e-4)
    print("KERNEL_OK")
</pallas_src>

<mosaic_0001>
module attributes {stable_mosaic.version = 11 : i64} {
  func.func @_gmm_kernel(%arg0: i32, %arg1: memref<16x32xf32, #tpu.memory_space<vmem>>, %arg2: memref<32x128xf32, #tpu.memory_space<vmem>>, %arg3: memref<32x128xf32, #tpu.memory_space<vmem>>, %arg4: memref<1x128xf32, #tpu.memory_space<vmem>>, %arg5: memref<1x128xf32, #tpu.memory_space<vmem>>, %arg6: memref<16x128xf32, #tpu.memory_space<vmem>>) attributes {dimension_semantics = [#tpu.dimension_semantics<parallel>], iteration_bounds = array<i64: 1>, scalar_prefetch = 0 : i64, scratch_operands = 0 : i64, tpu.core_type = #tpu.core_type<tc>, window_params = [{transform_indices = @transform_0, window_bounds = array<i64: 16, 32>}, {pipeline_mode = #tpu.pipeline_mode<synchronous>, transform_indices = @transform_1, window_bounds = array<i64: 32, 128>}, {pipeline_mode = #tpu.pipeline_mode<synchronous>, transform_indices = @transform_2, window_bounds = array<i64: 32, 128>}, {pipeline_mode = #tpu.pipeline_mode<synchronous>, transform_indices = @transform_3, window_bounds = array<i64: 1, 128>}, {pipeline_mode = #tpu.pipeline_mode<synchronous>, transform_indices = @transform_4, window_bounds = array<i64: 1, 128>}, {transform_indices = @transform_5, window_bounds = array<i64: 16, 128>}]} {
    %c0 = arith.constant 0 : index
    %c0_0 = arith.constant 0 : index
    %0 = vector.load %arg1[%c0, %c0_0] : memref<16x32xf32, #tpu.memory_space<vmem>>, vector<16x32xf32>
    %1 = arith.mulf %0, %0 : vector<16x32xf32>
    %c0_1 = arith.constant 0 : index
    %c0_2 = arith.constant 0 : index
    %2 = vector.load %arg2[%c0_1, %c0_2] : memref<32x128xf32, #tpu.memory_space<vmem>>, vector<32x128xf32>
    %cst = arith.constant dense<0.000000e+00> : vector<16x128xf32>
    %3 = tpu.matmul %1, %2, %cst {dimension_numbers = #tpu.dot_dimension_numbers<[1], [0], [0], [1], [0, 0, 1, 1], [], []>} : vector<16x32xf32>, vector<32x128xf32>, vector<16x128xf32> -> vector<16x128xf32>
    %c0_3 = arith.constant 0 : index
    %c0_4 = arith.constant 0 : index
    %4 = vector.load %arg3[%c0_3, %c0_4] : memref<32x128xf32, #tpu.memory_space<vmem>>, vector<32x128xf32>
    %cst_5 = arith.constant dense<0.000000e+00> : vector<16x128xf32>
    %5 = tpu.matmul %0, %4, %cst_5 {dimension_numbers = #tpu.dot_dimension_numbers<[1], [0], [0], [1], [0, 0, 1, 1], [], []>} : vector<16x32xf32>, vector<32x128xf32>, vector<16x128xf32> -> vector<16x128xf32>
    %6 = arith.addf %3, %5 : vector<16x128xf32>
    %c0_6 = arith.constant 0 : index
    %c0_7 = arith.constant 0 : index
    %7 = vector.load %arg4[%c0_6, %c0_7] : memref<1x128xf32, #tpu.memory_space<vmem>>, vector<1x128xf32>
    %8 = vector.broadcast %7 : vector<1x128xf32> to vector<16x128xf32>
    %9 = arith.subf %8, %6 : vector<16x128xf32>
    %c0_8 = arith.constant 0 : index
    %c0_9 = arith.constant 0 : index
    %10 = vector.load %arg5[%c0_8, %c0_9] : memref<1x128xf32, #tpu.memory_space<vmem>>, vector<1x128xf32>
    %11 = vector.broadcast %10 : vector<1x128xf32> to vector<16x128xf32>
    %12 = arith.addf %9, %11 : vector<16x128xf32>
    %cst_10 = arith.constant dense<0xFF800000> : vector<16xf32>
    %13 = vector.multi_reduction <maximumf>, %12, %cst_10 [1] : vector<16x128xf32> to vector<16xf32>
    %14 = vector.shape_cast %13 : vector<16xf32> to vector<16x1xf32>
    %15 = vector.broadcast %14 : vector<16x1xf32> to vector<16x128xf32>
    %16 = arith.subf %12, %15 : vector<16x128xf32>
    %17 = math.exp %16 : vector<16x128xf32>
    %cst_11 = arith.constant dense<0.000000e+00> : vector<16xf32>
    %18 = vector.multi_reduction <add>, %17, %cst_11 [1] : vector<16x128xf32> to vector<16xf32>
    %19 = vector.shape_cast %18 : vector<16xf32> to vector<16x1xf32>
    %20 = math.log %19 : vector<16x1xf32>
    %21 = arith.addf %14, %20 : vector<16x1xf32>
    %22 = tpu.iota {dimensions = array<i32: 1>} : vector<16x128xi32>
    %c4_i32 = arith.constant 4 : i32
    %23 = vector.broadcast %c4_i32 : i32 to vector<16x128xi32>
    %24 = arith.cmpi slt, %22, %23 : vector<16x128xi32>
    %25 = vector.shape_cast %21 : vector<16x1xf32> to vector<16x1xf32>
    %26 = vector.broadcast %25 : vector<16x1xf32> to vector<16x128xf32>
    %27 = arith.select %24, %9, %26 : vector<16x128xi1>, vector<16x128xf32>
    %c0_12 = arith.constant 0 : index
    %c0_13 = arith.constant 0 : index
    %28 = vector.load %arg6[%c0_12, %c0_13] : memref<16x128xf32, #tpu.memory_space<vmem>>, vector<16x128xf32>
    tpu.vector_store %arg6[%c0_12, %c0_13], %27 {strides = array<i32>} : memref<16x128xf32, #tpu.memory_space<vmem>>, vector<16x128xf32>,
    return
  }
  func.func @transform_0(%arg0: i32) -> (i32, i32) {
    %c0_i32 = arith.constant 0 : i32
    %c0_i32_0 = arith.constant 0 : i32
    return %arg0, %c0_i32 : i32, i32
  }
  func.func @transform_1(%arg0: i32) -> (i32, i32) {
    %c0_i32 = arith.constant 0 : i32
    %c0_i32_0 = arith.constant 0 : i32
    %c0_i32_1 = arith.constant 0 : i32
    return %c0_i32, %c0_i32_0 : i32, i32
  }
  func.func @transform_2(%arg0: i32) -> (i32, i32) {
    %c0_i32 = arith.constant 0 : i32
    %c0_i32_0 = arith.constant 0 : i32
    %c0_i32_1 = arith.constant 0 : i32
    return %c0_i32, %c0_i32_0 : i32, i32
  }
  func.func @transform_3(%arg0: i32) -> (i32, i32) {
    %c0_i32 = arith.constant 0 : i32
    %c0_i32_0 = arith.constant 0 : i32
    %c0_i32_1 = arith.constant 0 : i32
    return %c0_i32, %c0_i32_0 : i32, i32
  }
  func.func @transform_4(%arg0: i32) -> (i32, i32) {
    %c0_i32 = arith.constant 0 : i32
    %c0_i32_0 = arith.constant 0 : i32
    %c0_i32_1 = arith.constant 0 : i32
    return %c0_i32, %c0_i32_0 : i32, i32
  }
  func.func @transform_5(%arg0: i32) -> (i32, i32) {
    %c0_i32 = arith.constant 0 : i32
    %c0_i32_0 = arith.constant 0 : i32
    return %arg0, %c0_i32 : i32, i32
  }
}

</mosaic_0001>

<bundles_post_ra>
// kernel: tpu_custom_call.1
= control target key start
LH: loop header
LB: loop body
LE: loop exit
PB: predicated region body
PF: predicated region fallthrough
CT: control target
= control target key end

     0   :  { %10 = vsyncpa [#allocation3], 0  ;;  %s579_s0 = inlined_call_operand.hbm [shape: f32[16,32], index: 0, kind: input, shape index: {}]   ;;  %s580_s1 = inlined_call_operand.hbm [shape: f32[32,128], index: 1, kind: input, shape index: {}]   ;;  %s581_s2 = inlined_call_operand.hbm [shape: f32[32,128], index: 2, kind: input, shape index: {}]   ;;  %s582_s3 = inlined_call_operand.vmem [shape: f32[1,128], index: 3, kind: input, shape index: {}]   ;;  %s583_s4 = inlined_call_operand.vmem [shape: f32[1,128], index: 4, kind: input, shape index: {}]   ;;  %s584_s5 = inlined_call_operand.hbm [shape: f32[16,128], index: 5, kind: output, shape index: {}]  }
   0x1   :  { %11 = vsyncpa [#allocation6], 0 }
   0x2   :  { %12 = vsyncpa [#allocation4], 0  ;;  %s466_s18 = smov [#allocation5]   ;;  %s467_s20 = smov [#allocation2]  }
   0x3   :  { %s30_s19 = sshll.u32 %s466_s18, 4  ;;  %s18_s21 = sshll.u32 %s467_s20, 4  ;;  %s31_s19 = int_to_ptr.vmem [resolvable:$true] %s30_s19  ;;  %s502_s21 = int_to_ptr.vmem [resolvable:$true] %s18_s21 }
   0x4   :  { %s372_s24 = scalar_lea.hbm %s580_s1, 512 }
   0x5   :  { %p373_p0 = scmp.ne.s32.totalorder %s580_s1, %s372_s24  ;;  %p376_p1 = scmp.lt.u32.totalorder %s372_s24, %s580_s1 }
   0x7   :  { %p378_p2 = pnand %p376_p1, %p373_p0 }
   0x9   :  { %381 = shalt.err (!%p378_p2)
}
   0xa   :  { %s382_s29 = scalar_lea.vmem %s31_s19, 512  ;;  %p387_p4 = scmp.lt.s32.totalorder %s31_s19, %s31_s19 }
   0xb   :  { %p383_p3 = scmp.ne.s32.totalorder %s31_s19, %s382_s29  ;;  %p388_p5 = scmp.lt.s32.totalorder %s382_s29, %s382_s29 }
   0xd   :  { %p389_p6 = por %p388_p5, %p387_p4 }
   0xf   :  { %p390_p7 = pnand %p389_p6, %p383_p3 }
  0x11   :  { %393 = shalt.err (!%p390_p7)
}
  0x12   :  { %s468_s30 = smov 128   ;;  %s469_s6 = smov 8  }
  0x13   :  { %36 = dma.hbm_to_vmem [thread:$0]  %s580_s1, 512, %s31_s19, [#allocation6], %s468_s30, %s468_s30, %s469_s6  }
  0x14   :  { %s394_s11 = scalar_lea.hbm %s579_s0, 256 }
  0x15   :  { %p395_p8 = scmp.ne.s32.totalorder %s579_s0, %s394_s11  ;;  %p398_p9 = scmp.lt.u32.totalorder %s394_s11, %s579_s0 }
  0x17   :  { %p400_p10 = pnand %p398_p9, %p395_p8 }
  0x19   :  { %403 = shalt.err (!%p400_p10)
}
  0x1a   :  { %s404_s16 = scalar_lea.vmem %s502_s21, 256  ;;  %p409_p12 = scmp.lt.s32.totalorder %s502_s21, %s502_s21 }
  0x1b   :  { %p405_p11 = scmp.ne.s32.totalorder %s502_s21, %s404_s16  ;;  %p410_p13 = scmp.lt.s32.totalorder %s404_s16, %s404_s16 }
  0x1d   :  { %p411_p0 = por %p410_p13, %p409_p12 }
  0x1f   :  { %p412_p1 = pnand %p411_p0, %p405_p11 }
  0x21   :  { %415 = shalt.err (!%p412_p1)
}
  0x22   :  { %24 = dma.hbm_to_vmem [thread:$0]  %s579_s0, 256, %s502_s21, [#allocation3], %s468_s30, %s468_s30, %s469_s6  }
  0x23   :  { %s470_s18 = smov [#allocation7]   ;;  %s416_s23 = scalar_lea.hbm %s581_s2, 512 }
  0x24   :  { %s42_s19 = sshll.u32 %s470_s18, 4  ;;  %p417_p2 = scmp.ne.s32.totalorder %s581_s2, %s416_s23  ;;  %s43_s19 = int_to_ptr.vmem [resolvable:$true] %s42_s19 }
  0x25   :  { %p420_p3 = scmp.lt.u32.totalorder %s416_s23, %s581_s2 }
  0x27   :  { %p422_p4 = pnand %p420_p3, %p417_p2 }
  0x29   :  { %425 = shalt.err (!%p422_p4)
}
  0x2a   :  { %s426_s28 = scalar_lea.vmem %s43_s19, 512  ;;  %p431_p6 = scmp.lt.s32.totalorder %s43_s19, %s43_s19 }
  0x2b   :  { %p427_p5 = scmp.ne.s32.totalorder %s43_s19, %s426_s28  ;;  %p432_p7 = scmp.lt.s32.totalorder %s426_s28, %s426_s28 }
  0x2d   :  { %p433_p8 = por %p432_p7, %p431_p6 }
  0x2f   :  { %p434_p9 = pnand %p433_p8, %p427_p5 }
  0x31   :  { %437 = shalt.err (!%p434_p9)
}
  0x32   :  { %48 = dma.hbm_to_vmem [thread:$0]  %s581_s2, 512, %s43_s19, [#allocation6], %s468_s30, %s468_s30, %s469_s6  }
  0x33   :  { %460 = dma.done.wait [#allocation3], 256  }
  0x34   :  { %461 = vsyncadd [#allocation3], 4294967040 }
  0x35   :  { %462 = dma.done.wait [#allocation6], 1024  }
  0x36   :  { %463 = vsyncadd [#allocation6], 4294966272  ;;  %v70_v0 = vld [vmem:[#allocation7] sm:$0xff]  ;;  %v71_v1 = vld [vmem:[#allocation7 + $0x8] sm:$0xff]  ;;  %vm74_vm0 = vcmask 261120   ;;  %v275_v38 = vlaneseq }
  0x37   :  { %v66_v2 = vld [vmem:[#allocation5] sm:$0xff]  ;;  %v340_v3 = vpack.c.bf16 %v71_v1, %v70_v0  ;;  %v67_v4 = vld [vmem:[#allocation5 + $0x8] sm:$0xff]  ;;  %v72_v5 = vld [vmem:[#allocation7 + $0x10] sm:$0xff] }
  0x38   :  { %v73_v6 = vld [vmem:[#allocation7 + $0x18] sm:$0xff]  ;;  %v348_v7 = vpack.c.bf16 %v67_v4, %v66_v2  ;;  %v68_v9 = vld [vmem:[#allocation5 + $0x10] sm:$0xff]  ;;  %v276_v39 = vand.u32 127, %v275_v38 }
  0x39   :  { %v344_v8 = vpack.c.bf16 %v73_v6, %v72_v5  ;;  %v69_v10 = vld [vmem:[#allocation5 + $0x18] sm:$0xff]  ;;  %v62_v11 = vld [vmem:[#allocation2] sm:$0xff]  ;;  %341 = vmatprep.subr.bf16.mxu1 %v340_v3 }
  0x3a   :  { %v352_v12 = vpack.c.bf16 %v69_v10, %v68_v9  ;;  %326 = vmatprep.mubr.msk.f32.mxu1 %vm74_vm0, %v62_v11  ;;  %v64_v13 = vmul.f32 %v62_v11, %v62_v11  ;;  %349 = vmatprep.subr.bf16.mxu0 %v348_v7  ;;  %v63_v14 = vld [vmem:[#allocation2 + $0x8] sm:$0xff]  ;;  %v304_v20 = vld [vmem:[%s582_s3] ss:$0 sm:$0xff]  ;;  %vm277_vm1 = vcmp.lt.s32.totalorder %v276_v39, 4  ;;  %s471_s3 = smov [#allocation8]  }
  0x3b   :  { %343 = vmatpush3.bf16.msra.mxu1 %v340_v3  ;;  %351 = vmatpush3.bf16.msra.mxu0 %v348_v7  ;;  %v65_v15 = vmul.f32 %v63_v14, %v63_v14  ;;  %v305_v23 = vld [vmem:[%s583_s4] ss:$0 sm:$0xff]  ;;  %s287_s4 = sshll.u32 %s471_s3, 4  ;;  %s288_s4 = int_to_ptr.vmem [resolvable:$true] %s287_s4 }
  0x3c   :  { %345 = vmatprep.subr.bf16.mxu1 %v344_v8  ;;  %353 = vmatprep.subr.bf16.mxu0 %v352_v12  ;;  %s438_s9 = scalar_lea.vmem %s288_s4, 256  ;;  %p443_p11 = scmp.lt.s32.totalorder %s288_s4, %s288_s4 }
  0x3d   :  { %337 = vmatprep.mubr.msk.f32.mxu0 %vm74_vm0, %v64_v13  ;;  %p439_p10 = scmp.ne.s32.totalorder %s288_s4, %s438_s9  ;;  %p444_p12 = scmp.lt.s32.totalorder %s438_s9, %s438_s9 }
  0x3f   :  { %347 = vmatpush3.bf16.msra.mxu1 %v344_v8  ;;  %355 = vmatpush3.bf16.msra.mxu0 %v352_v12  ;;  %p445_p13 = por %p444_p12, %p443_p11 }
  0x41   :  { %p446_p0 = pnand %p445_p13, %p439_p10 }
  0x42   :  { %327 = vmatmul.mubr.msk.f32.vlgmr.msra.gmra.mrb[0].mxu1 %vm74_vm0, %v63_v14  ;;  %338 = vmatmul.mubr.msk.f32.vlgmr.msra.gmra.mrb[0].mxu0 %vm74_vm0, %v65_v15 }
 0x115   :  { %v328_v16 = vpop.f32.mrb[0].mxu1  ;;  %v339_v17 = vpop.f32.mrb[0].mxu0 }
 0x116   :  { %v147_v18 = vpop.f32.mrb[1].mxu1  ;;  %v234_v19 = vadd.f32 %v339_v17, %v328_v16  ;;  %v228_v21 = vpop.f32.mrb[1].mxu0 }
 0x117   :  { %v229_v22 = vadd.f32 %v228_v21, %v147_v18 }
 0x118   :  { %v245_v25 = vsub.f32 %v304_v20, %v234_v19 }
 0x119   :  { %v244_v24 = vsub.f32 %v304_v20, %v229_v22 }
 0x11a   :  { %v254_v27 = vadd.f32 %v305_v23, %v245_v25 }
 0x11b   :  { %v253_v26 = vadd.f32 %v305_v23, %v244_v24 }
 0x11d   :  { %255 = vmax.xlane.f32.xlu0 %v253_v26 }
 0x121   :  { %257 = vmax.xlane.f32.xlu0 %v254_v27 }
 0x1aa   :  { %v256_v28 = vpop.xlane.xlu0 %255 }
 0x1ab   :  { %v259_v29 = vsub.f32 %v253_v26, %v256_v28 }
 0x1ad   :  { %v261_v30 = vmul.f32 1.442695, %v259_v29 }
 0x1ae   :  { %v258_v31 = vpop.xlane.xlu0 %257 }
 0x1af   :  { %v260_v32 = vsub.f32 %v254_v27, %v258_v31  ;;  %364 = vpow2.f32 %v261_v30 }
 0x1b1   :  { %v263_v33 = vmul.f32 1.442695, %v260_v32 }
 0x1b3   :  { %366 = vpow2.f32 %v263_v33 }
 0x1b9   :  { %v365_v34 = vpop.eup %364 }
 0x1ba   :  { %265 = vadd.xlane.f32.xlu1 %v365_v34 }
 0x1bd   :  { %v367_v35 = vpop.eup %366 }
 0x1be   :  { %267 = vadd.xlane.f32.xlu1 %v367_v35 }
 0x247   :  { %v266_v36 = vpop.xlane.xlu1 %265 }
 0x248   :  { %368 = vlog2.f32 %v266_v36 }
 0x24b   :  { %v268_v37 = vpop.xlane.xlu1 %267 }
 0x24c   :  { %370 = vlog2.f32 %v268_v37 }
 0x252   :  { %v369_v40 = vpop.eup %368 }
 0x253   :  { %v270_v41 = vmul.f32 0.6931472, %v369_v40 }
 0x255   :  { %v273_v42 = vadd.f32 %v270_v41, %v256_v28 }
 0x256   :  { %v371_v43 = vpop.eup %370 }
 0x257   :  { %v272_v44 = vmul.f32 0.6931472, %v371_v43  ;;  %v278_v45 = vsel %vm277_vm1, %v244_v24, %v273_v42 }
 0x258   :  { %280 = vst [vmem:[#allocation8] sm:$0xff] %v278_v45 }
 0x259   :  { %v274_v46 = vadd.f32 %v272_v44, %v258_v31 }
 0x25b   :  { %v279_v47 = vsel %vm277_vm1, %v245_v25, %v274_v46 }
 0x25c   :  { %281 = vst [vmem:[#allocation8 + $0x8] sm:$0xff] %v279_v47 }
 0x25d   :  { %449 = shalt.err (!%p446_p0)
}
 0x25e   :  { %s450_s12 = scalar_lea.hbm %s584_s5, 256 }
 0x25f   :  { %p451_p1 = scmp.ne.s32.totalorder %s584_s5, %s450_s12  ;;  %p454_p2 = scmp.lt.u32.totalorder %s450_s12, %s584_s5 }
 0x261   :  { %p456_p3 = pnand %p454_p2, %p451_p1 }
 0x263   :  { %459 = shalt.err (!%p456_p3)
}
 0x264   :  { %293 = dma.vmem_to_hbm [thread:$0]  %s288_s4, 256, %s584_s5, [#allocation4], %s468_s30, %s468_s30, %s469_s6  }
 0x265   :  { %464 = dma.done.wait [#allocation4], 256  }
 0x266   :  { %465 = vsyncadd [#allocation4], 4294967040 }
 0x267   :  { %297 = vsyncpa [#allocation3], 1 }
 0x268   :  { %298 = vsyncpa [#allocation6], 1 }
 0x269   :  { %299 = vsyncpa [#allocation4], 1 }

</bundles_post_ra>
